<compile_context>
chip_gen: v5e
topology: v5e:2x2
jax: 0.10.0
libtpu: 0.0.40
codegen_flags: <defaults>
</compile_context>

<pallas_src>
import jax
import jax.numpy as jnp
from jax.experimental import pallas as pl
from jax.experimental.pallas import tpu as pltpu

LANE = 128
MAX_TILE_C = 2048                      # lane tile bound (multiple of 128)
TARGET_BLOCK_BYTES = 4 * 1024 * 1024   # per-buffer tile budget (x and out)


def _standardize_kernel(x_ref, mean_ref, inv_ref, o_ref):
    # Pure VPU hot path: subtract broadcasted mean, multiply by broadcasted
    # exact reciprocal of std (precomputed once in the wrapper).
    o_ref[...] = (x_ref[...] - mean_ref[...]) * inv_ref[...]


def _standardize_2d(x2: jax.Array, mean_row: jax.Array, inv_row: jax.Array):
    """Run the kernel on a 2-D array with (1, C) mean / inv-std rows."""
    R, C = x2.shape
    itemsize = jnp.dtype(x2.dtype).itemsize

    # Lane (last-dim) tiling: full C when it fits, else a big multiple of 128.
    tile_c = C if C <= MAX_TILE_C else MAX_TILE_C

    # Row tiling: as many rows as fit the per-buffer budget, multiple of 8.
    row_bytes = max(1, tile_c * itemsize)
    tile_r = max(1, TARGET_BLOCK_BYTES // row_bytes)
    tile_r = min(tile_r, R)
    if R >= 8:
        tile_r = max(8, (tile_r // 8) * 8)
    else:
        tile_r = R  # block == full (small) dim is always legal

    grid = (pl.cdiv(R, tile_r), pl.cdiv(C, tile_c))

    # VMEM budget: x + out double-buffered tiles, mean/inv rows, + headroom.
    blk_bytes = tile_r * tile_c * itemsize
    row_blk_bytes = tile_c * itemsize
    vmem_bytes = 2 * 2 * blk_bytes + 2 * 2 * row_blk_bytes + (4 << 20)
    vmem_bytes = int(min(vmem_bytes, 48 << 20))

    return pl.pallas_call(
        _standardize_kernel,
        out_shape=jax.ShapeDtypeStruct((R, C), x2.dtype),
        grid_spec=pltpu.PrefetchScalarGridSpec(
            num_scalar_prefetch=0,
            grid=grid,
            in_specs=[
                pl.BlockSpec((tile_r, tile_c), lambda i, j: (i, j)),
                pl.BlockSpec((1, tile_c), lambda i, j: (0, j)),
                pl.BlockSpec((1, tile_c), lambda i, j: (0, j)),
            ],
            out_specs=pl.BlockSpec((tile_r, tile_c), lambda i, j: (i, j)),
        ),
        compiler_params=pltpu.CompilerParams(
            dimension_semantics=("parallel", "parallel"),
            vmem_limit_bytes=vmem_bytes,
        ),
    )(x2, mean_row, inv_row)


def _as_feature_row(v, F: int) -> jax.Array:
    """Accept scalar / (F,) / (1, F) parameters, return a flat (F,) f32 vector."""
    v = jnp.ravel(jnp.asarray(v, dtype=jnp.float32))
    if v.size == 1:
        v = jnp.broadcast_to(v, (F,))
    return v


def standardize(x: jax.Array, mean, std) -> jax.Array:
    """(x - mean) / std, broadcasting mean/std over the last dim (PyTorch semantics)."""
    orig_shape = x.shape
    F = orig_shape[-1]
    dtype = x.dtype

    # O(F) wrapper-side precompute: exact reciprocal (not approx) so results
    # stay within tight tolerance of the reference divide.
    mean_v = _as_feature_row(mean, F)
    std_v = _as_feature_row(std, F)
    inv_v = (1.0 / std_v).astype(dtype)
    mean_v = mean_v.astype(dtype)

    x2 = x.reshape(-1, F)
    B = x2.shape[0]

    # Lane-dense repack for narrow feature dims: view rows as width k*F
    # (a multiple of 128) so output stores are unmasked full-lane writes.
    if F < LANE and LANE % F == 0:
        for W in (4 * LANE, 2 * LANE, LANE):
            k = W // F
            if k >= 1 and B % k == 0:
                xr = x2.reshape(B // k, W)
                mr = jnp.tile(mean_v, k).reshape(1, W)
                ir = jnp.tile(inv_v, k).reshape(1, W)
                out = _standardize_2d(xr, mr, ir)
                return out.reshape(orig_shape)
        # TODO(synk): if B never divides the repeat factor, we fall through to
        # the sub-128-lane (masked-store) path instead of padding the batch.

    out = _standardize_2d(x2, mean_v.reshape(1, F), inv_v.reshape(1, F))
    return out.reshape(orig_shape)


if __name__ == "__main__":
    key = jax.random.PRNGKey(0)
    kx, km, ks, kx2 = jax.random.split(key, 4)

    # Small shapes consistent with the module: batch=16, hidden=32.
    B, F = 16, 32
    x = jax.random.normal(kx, (B, F), dtype=jnp.float32)
    mean = jax.random.normal(km, (F,), dtype=jnp.float32)
    std = jax.nn.softplus(jax.random.normal(ks, (F,), dtype=jnp.float32)) + 0.1

    out = standardize(x, mean, std)
    out = jax.block_until_ready(out)
    ref = (x - mean[None, :]) / std[None, :]
    assert jnp.allclose(out, ref, atol=1e-6, rtol=1e-6), "mismatch vs reference (lane-dense path)"

    # Also exercise the general (wide / ragged-row) path.
    B2, F2 = 12, 256
    x2 = jax.random.normal(kx2, (B2, F2), dtype=jnp.float32)
    mean2 = jnp.linspace(-1.0, 1.0, F2, dtype=jnp.float32)
    std2 = jnp.linspace(0.5, 2.0, F2, dtype=jnp.float32)
    out2 = jax.block_until_ready(standardize(x2, mean2, std2))
    ref2 = (x2 - mean2[None, :]) / std2[None, :]
    assert jnp.allclose(out2, ref2, atol=1e-6, rtol=1e-6), "mismatch vs reference (general path)"

    # Scalar mean/std broadcast case (PyTorch module accepts floats).
    out3 = jax.block_until_ready(standardize(x, 0.5, 2.0))
    ref3 = (x - 0.5) / 2.0
    assert jnp.allclose(out3, ref3, atol=1e-6, rtol=1e-6), "mismatch vs reference (scalar path)"

    print("KERNEL_OK")
</pallas_src>

<mosaic_0001>
module attributes {stable_mosaic.version = 11 : i64} {
  func.func @_standardize_kernel(%arg0: i32, %arg1: i32, %arg2: memref<1x512xf32, #tpu.memory_space<vmem>>, %arg3: memref<1x512xf32, #tpu.memory_space<vmem>>, %arg4: memref<1x512xf32, #tpu.memory_space<vmem>>, %arg5: memref<1x512xf32, #tpu.memory_space<vmem>>) attributes {dimension_semantics = [#tpu.dimension_semantics<parallel>, #tpu.dimension_semantics<parallel>], iteration_bounds = array<i64: 1, 1>, scalar_prefetch = 0 : i64, scratch_operands = 0 : i64, tpu.core_type = #tpu.core_type<tc>, window_params = [{transform_indices = @transform_0, window_bounds = array<i64: 1, 512>}, {transform_indices = @transform_1, window_bounds = array<i64: 1, 512>}, {transform_indices = @transform_2, window_bounds = array<i64: 1, 512>}, {transform_indices = @transform_3, window_bounds = array<i64: 1, 512>}]} {
    %c0 = arith.constant 0 : index
    %c0_0 = arith.constant 0 : index
    %0 = vector.load %arg2[%c0, %c0_0] : memref<1x512xf32, #tpu.memory_space<vmem>>, vector<1x512xf32>
    %c0_1 = arith.constant 0 : index
    %c0_2 = arith.constant 0 : index
    %1 = vector.load %arg3[%c0_1, %c0_2] : memref<1x512xf32, #tpu.memory_space<vmem>>, vector<1x512xf32>
    %2 = arith.subf %0, %1 : vector<1x512xf32>
    %c0_3 = arith.constant 0 : index
    %c0_4 = arith.constant 0 : index
    %3 = vector.load %arg4[%c0_3, %c0_4] : memref<1x512xf32, #tpu.memory_space<vmem>>, vector<1x512xf32>
    %4 = arith.mulf %2, %3 : vector<1x512xf32>
    %c0_5 = arith.constant 0 : index
    %c0_6 = arith.constant 0 : index
    %5 = vector.load %arg5[%c0_5, %c0_6] : memref<1x512xf32, #tpu.memory_space<vmem>>, vector<1x512xf32>
    tpu.vector_store %arg5[%c0_5, %c0_6], %4 {strides = array<i32>} : memref<1x512xf32, #tpu.memory_space<vmem>>, vector<1x512xf32>,
    return
  }
  func.func @transform_0(%arg0: i32, %arg1: i32) -> (i32, i32) {
    %c0_i32 = arith.constant 0 : i32
    return %arg0, %arg1 : i32, i32
  }
  func.func @transform_1(%arg0: i32, %arg1: i32) -> (i32, i32) {
    %c0_i32 = arith.constant 0 : i32
    %c0_i32_0 = arith.constant 0 : i32
    return %c0_i32, %arg1 : i32, i32
  }
  func.func @transform_2(%arg0: i32, %arg1: i32) -> (i32, i32) {
    %c0_i32 = arith.constant 0 : i32
    %c0_i32_0 = arith.constant 0 : i32
    return %c0_i32, %arg1 : i32, i32
  }
  func.func @transform_3(%arg0: i32, %arg1: i32) -> (i32, i32) {
    %c0_i32 = arith.constant 0 : i32
    return %arg0, %arg1 : i32, i32
  }
}

</mosaic_0001>

<bundles_post_ra>
// kernel: tpu_custom_call.1
= control target key start
LH: loop header
LB: loop body
LE: loop exit
PB: predicated region body
PF: predicated region fallthrough
CT: control target
= control target key end

     0   :  { %8 = vsyncpa [#allocation3], 0  ;;  %s226_s0 = inlined_call_operand.hbm [shape: f32[1,512], index: 0, kind: input, shape index: {}]   ;;  %s227_s1 = inlined_call_operand.hbm [shape: f32[1,512], index: 1, kind: input, shape index: {}]   ;;  %s228_s2 = inlined_call_operand.hbm [shape: f32[1,512], index: 2, kind: input, shape index: {}]   ;;  %s229_s3 = inlined_call_operand.hbm [shape: f32[1,512], index: 3, kind: output, shape index: {}]  }
   0x1   :  { %9 = vsyncpa [#allocation6], 0  ;;  %s27_s14 = sshll.u32 %s227_s1, 4  ;;  %s28_s14 = int_to_ptr.hbm [resolvable:$true] %s27_s14 }
   0x2   :  { %10 = vsyncpa [#allocation4], 0  ;;  %s190_s15 = smov [#allocation5]   ;;  %s16_s19 = sshll.u32 %s226_s0, 4  ;;  %s17_s19 = int_to_ptr.hbm [resolvable:$true] %s16_s19 }
   0x3   :  { %s29_s16 = sshll.u32 %s190_s15, 4  ;;  %s191_s20 = smov [#allocation2]   ;;  %s30_s16 = int_to_ptr.vmem [resolvable:$true] %s29_s16 }
   0x4   :  { %32 = dma.hbm_to_vmem [thread:$0]  %s28_s14, 64, %s30_s16, [#allocation6]  }
   0x5   :  { %s18_s21 = sshll.u32 %s191_s20, 4  ;;  %s38_s24 = sshll.u32 %s228_s2, 4  ;;  %s19_s21 = int_to_ptr.vmem [resolvable:$true] %s18_s21  ;;  %s39_s24 = int_to_ptr.hbm [resolvable:$true] %s38_s24 }
   0x6   :  { %21 = dma.hbm_to_vmem [thread:$0]  %s17_s19, 64, %s19_s21, [#allocation3]  }
   0x7   :  { %s192_s1 = smov [#allocation7]  }
   0x8   :  { %s40_s25 = sshll.u32 %s192_s1, 4  ;;  %s41_s25 = int_to_ptr.vmem [resolvable:$true] %s40_s25 }
   0x9   :  { %43 = dma.hbm_to_vmem [thread:$0]  %s39_s24, 64, %s41_s25, [#allocation6]  }
   0xa   :  { %184 = dma.done.wait [#allocation3], 64  }
   0xb   :  { %185 = vsyncadd [#allocation3], 4294967232 }
   0xc   :  { %186 = dma.done.wait [#allocation6], 128  }
   0xd   :  { %187 = vsyncadd [#allocation6], 4294967168  ;;  %v61_v0 = vlaneseq  ;;  %s193_s0 = smov [#allocation8]   ;;  %s73_s29 = sshll.u32 %s229_s3, 4  ;;  %v56_v1 = vld [vmem:[#allocation2] sm:$0xf]  ;;  %s74_s29 = int_to_ptr.hbm [resolvable:$true] %s73_s29 }
   0xe   :  { %s71_s26 = sshll.u32 %s193_s0, 4  ;;  %v57_v2 = vld [vmem:[#allocation5] sm:$0xf]  ;;  %v59_v3 = vld [vmem:[#allocation7] sm:$0xf]  ;;  %s72_s26 = int_to_ptr.vmem [resolvable:$true] %s71_s26 }
   0xf   :  { %v58_v4 = vsub.f32 %v56_v1, %v57_v2  ;;  %vm63_vm0 = vcmp.lt.s32.totalorder %v61_v0, 512 }
  0x11   :  { %v60_v5 = vmul.f32 %v59_v3, %v58_v4 }
  0x13   :  { %65 = vst.msk [vmem:[#allocation8] sm:$0xf] %vm63_vm0, %v60_v5 }
  0x14   :  { %76 = dma.vmem_to_hbm [thread:$0]  %s72_s26, 64, %s74_s29, [#allocation4]  }
  0x15   :  { %188 = dma.done.wait [#allocation4], 64  }
  0x16   :  { %189 = vsyncadd [#allocation4], 4294967232 }
  0x17   :  { %81 = vsyncpa [#allocation3], 1 }
  0x18   :  { %82 = vsyncpa [#allocation6], 1 }
  0x19   :  { %83 = vsyncpa [#allocation4], 1 }

</bundles_post_ra>
